<compile_context>
chip_gen: v5e
topology: v5e:2x2
jax: 0.10.0
libtpu: 0.0.40
codegen_flags: <defaults>
</compile_context>

<pallas_src>
import functools

import numpy as np
import jax
import jax.numpy as jnp
from jax import lax
from jax.experimental import pallas as pl
from jax.experimental.pallas import tpu as pltpu


# ----------------------------------------------------------------------------
# Small helpers
# ----------------------------------------------------------------------------
def _round_up(a, b):
    return -(-a // b) * b


def _vmem_capacity_bytes():
    try:
        return int(pltpu.get_tpu_info().vmem_capacity_bytes)
    except Exception:
        return 64 * 1024 * 1024          # conservative (v7x-sized) fallback


def _vmem_block_bytes(gb, s_pad, kk, x_bytes, out_bytes):
    """Double-buffered input/output/filter/mask block footprint (f32 filters
    and masks; lane/sublane padding of the tiny blocks included)."""
    x_blk = gb * s_pad * x_bytes
    o_blk = gb * s_pad * out_bytes
    w_blk = gb * _round_up(kk, 128) * 4
    m_blk = _round_up(kk, 8) * s_pad * 4
    return 2 * (x_blk + o_blk + w_blk + m_blk)


def _pick_channel_block(G, s_pad, kk, x_bytes, out_bytes, sub):
    """Pick the channel-block height (multiple of `sub` sublanes) and the
    vmem_limit_bytes, generation-aware."""
    cap = _vmem_capacity_bytes()
    budget = int(cap * 0.62)   # ~40 MiB on v7x (64 MiB VMEM), ~79 MiB on v5e/v6e (128 MiB)
    limit = int(cap * 0.78)    # ~50 MiB on v7x,               ~100 MiB on v5e/v6e
    g_sub = _round_up(G, sub)
    # Cap at ~half the channels so the 'parallel' grid axis has >=2 steps
    # (lets the axis shard across v7x's two TensorCores); also cap at 4096.
    max_gb = g_sub if g_sub <= sub else _round_up(-(-g_sub // 2), sub)
    cand = max(sub, _round_up(min(max_gb, 4096), sub))
    while True:
        if _vmem_block_bytes(cand, s_pad, kk, x_bytes, out_bytes) <= budget:
            return cand, limit
        if cand <= sub:
            # TODO(synk): add a spatially tiled (halo'd) path for huge H*W.
            raise ValueError(
                "SelfDWConv2d Pallas kernel: even a %d-channel block with the "
                "full %d-lane spatial extent does not fit the VMEM budget "
                "(%d bytes); spatial tiling is not implemented." % (sub, s_pad, budget))
        cand = max(sub, _round_up(cand // 2, sub))


def _pick_rows(gb, s_pad, sub):
    """Channel-strip height for the in-kernel loop: big enough to amortize
    loop overhead, small enough that the f32 accumulator (rows x s_pad) stays
    register-resident (<= ~8 vregs)."""
    r = (32 * 1024) // (s_pad * 4)
    r = max(sub, min(32, (r // sub) * sub))
    while gb % r:
        r -= sub
    return max(r, sub)


def _tap_masks(H, W, k, s_pad):
    """Per-tap {0,1} border-validity masks over the flattened (padded) spatial
    axis.  Static given (H, W, k); built host-side with numpy."""
    p = k // 2
    hh = np.arange(H)[:, None]
    ww = np.arange(W)[None, :]
    m = np.zeros((k * k, s_pad), np.float32)
    for i in range(k):
        for j in range(k):
            di, dj = i - p, j - p
            valid = ((hh + di >= 0) & (hh + di < H) &
                     (ww + dj >= 0) & (ww + dj < W))
            m[i * k + j, :H * W] = valid.reshape(-1).astype(np.float32)
    return jnp.asarray(m)


# ----------------------------------------------------------------------------
# Pallas kernel: per-channel k x k 'same' cross-correlation on a
# (channels, H*W) block.  Channels on sublanes, flattened spatial on lanes.
# ----------------------------------------------------------------------------
def _dw_conv_flat_kernel(x_ref, w_ref, m_ref, o_ref, *, k, img_w, s_pad, rows):
    # x_ref: (gb, s_pad)   input block
    # w_ref: (gb, k*k)     per-channel dynamic filters (f32)
    # m_ref: (k*k, s_pad)  per-tap {0,1} border masks (f32)
    # o_ref: (gb, s_pad)   output block
    kk = k * k
    p = k // 2
    gb = x_ref.shape[0]
    nstrips = gb // rows
    centre = p * k + p

    # Hoist the tiny per-tap mask rows out of the strip loop (loop-invariant).
    tap_mask = [m_ref[t:t + 1, :] for t in range(kk)]

    def strip(s, carry):
        r0 = pl.multiple_of(s * rows, rows)
        xs = x_ref[pl.ds(r0, rows), :].astype(jnp.float32)      # (rows, s_pad)
        ws = w_ref[pl.ds(r0, rows), :].astype(jnp.float32)      # (rows, kk)

        # Centre tap: no shift, always valid.
        acc = xs * ws[:, centre:centre + 1]

        # Remaining k*k - 1 taps: lane rotation (XLU) + border mask + per-
        # channel weight (lane-broadcast of a per-sublane scalar).  The
        # accumulator never leaves vregs; out rows are stored exactly once.
        for i in range(k):
            for j in range(k):
                t = i * k + j
                if t == centre:
                    continue
                delta = (i - p) * img_w + (j - p)               # flat-index shift
                shifted = pltpu.roll(xs, shift=(-delta) % s_pad, axis=1)
                acc = acc + (shifted * tap_mask[t]) * ws[:, t:t + 1]

        o_ref[pl.ds(r0, rows), :] = acc.astype(o_ref.dtype)
        return carry

    lax.fori_loop(0, nstrips, strip, 0, unroll=nstrips <= 8)


def dyn_depthwise_conv_same(x, filt):
    """x: (B, C, H, W), filt: (B, C, k, k).
    out[b, c] = corr2d(x[b, c], filt[b, c]), stride 1, symmetric 'same' zero
    padding (odd k) -- exactly F.conv2d(rearr(x), rearr(filt), groups=B*C,
    padding='same').  I/O dtype follows x (f32 or bf16); accumulation is f32."""
    B, C, H, W = x.shape
    assert filt.shape[:2] == (B, C)
    k = filt.shape[-1]
    assert k % 2 == 1, "odd kernel size assumed (symmetric 'same' padding)"
    G, S, kk = B * C, H * W, k * k

    x_bytes = jnp.dtype(x.dtype).itemsize
    sub = 8 if x_bytes == 4 else 16                 # sublane packing unit
    s_pad = _round_up(S, 128)                       # lane-dense flat spatial axis

    gb, vmem_limit = _pick_channel_block(G, s_pad, kk, x_bytes, x_bytes, sub)
    G_pad = _round_up(G, gb)
    rows = _pick_rows(gb, s_pad, sub)

    # Layout plumbing: the reshapes below are free (row-major merges); padding
    # is only materialized for awkward shapes (H*W % 128 != 0 or ragged B*C).
    x2 = x.reshape(G, S)
    w2 = filt.reshape(G, kk).astype(jnp.float32)
    if s_pad != S:
        x2 = jnp.pad(x2, ((0, 0), (0, s_pad - S)))
    if G_pad != G:
        x2 = jnp.pad(x2, ((0, G_pad - G), (0, 0)))
        w2 = jnp.pad(w2, ((0, G_pad - G), (0, 0)))
    masks = _tap_masks(H, W, k, s_pad)

    kernel = functools.partial(_dw_conv_flat_kernel,
                               k=k, img_w=W, s_pad=s_pad, rows=rows)
    out2 = pl.pallas_call(
        kernel,
        out_shape=jax.ShapeDtypeStruct((G_pad, s_pad), x.dtype),
        grid=(G_pad // gb,),
        in_specs=[
            pl.BlockSpec((gb, s_pad), lambda g: (g, 0)),
            pl.BlockSpec((gb, kk), lambda g: (g, 0)),
            pl.BlockSpec((kk, s_pad), lambda g: (0, 0)),
        ],
        out_specs=pl.BlockSpec((gb, s_pad), lambda g: (g, 0)),
        compiler_params=pltpu.CompilerParams(
            dimension_semantics=("parallel",),
            vmem_limit_bytes=vmem_limit),
    )(x2, w2, masks)

    if G_pad != G or s_pad != S:
        out2 = out2[:G, :S]
    return out2.reshape(B, C, H, W)


# ----------------------------------------------------------------------------
# Filter-generation glue (tiny k x k tensors) -- plain JAX on purpose: a
# pallas_call here is pure launch overhead for a few hundred bytes of work.
# ----------------------------------------------------------------------------
def _adaptive_pool_matrix(in_size, out_size):
    # PyTorch AdaptiveAvgPool2d bins: start=floor(i*H/k), end=ceil((i+1)*H/k)
    P = np.zeros((out_size, in_size), np.float32)
    for i in range(out_size):
        s = (i * in_size) // out_size
        e = -((-(i + 1) * in_size) // out_size)
        P[i, s:e] = 1.0 / (e - s)
    return jnp.asarray(P)


def adaptive_avg_pool2d(x, out_size):
    _, _, H, W = x.shape
    Ph = _adaptive_pool_matrix(H, out_size)
    Pw = _adaptive_pool_matrix(W, out_size)
    return jnp.einsum('ih,bchw,jw->bcij', Ph, x, Pw)


def layer_norm_ckk(x, weight, bias, eps=1e-5):
    # nn.LayerNorm([C, k, k]): normalize over the last 3 dims, biased variance.
    mean = jnp.mean(x, axis=(1, 2, 3), keepdims=True)
    var = jnp.mean((x - mean) ** 2, axis=(1, 2, 3), keepdims=True)
    xn = (x - mean) / jnp.sqrt(var + eps)
    return xn * weight[None] + bias[None]


def depthwise_conv_same_tiny(x, w):
    """conv0: static depthwise 'same' conv on the tiny pooled maps.
    x: (B, C, k, k), w: (C, k, k)."""
    B, C, kh, kw = x.shape
    p = kh // 2
    xp = jnp.pad(x, ((0, 0), (0, 0), (p, p), (p, p)))
    out = jnp.zeros_like(x)
    for i in range(kh):
        for j in range(kw):
            out = out + xp[:, :, i:i + kh, j:j + kw] * w[None, :, i, j, None, None]
    return out


def init_params(key, in_channels, out_channels, kernel_size):
    # Deterministic synthetic init (module __init__ only defines shapes).
    # The final rearrange in the reference forward requires out_channels == C.
    assert out_channels == in_channels
    C, k = in_channels, kernel_size
    k0, k1, k2, k3, k4 = jax.random.split(key, 5)
    return dict(
        ln0_w=1.0 + 0.02 * jax.random.normal(k0, (C, k, k), jnp.float32),
        ln0_b=0.02 * jax.random.normal(k1, (C, k, k), jnp.float32),
        conv0_w=0.2 * jax.random.normal(k2, (out_channels, 1, k, k), jnp.float32),
        ln1_w=1.0 + 0.02 * jax.random.normal(k3, (C, k, k), jnp.float32),
        ln1_b=0.02 * jax.random.normal(k4, (C, k, k), jnp.float32),
    )


def self_dw_conv2d(params, x, kernel_size):
    """Forward pass of SelfDWConv2d.  x: (B, C, H, W) -> (B, C, H, W)."""
    k = kernel_size

    # --- dynamic filter generation (tiny k x k maps; plain JAX) ---
    y = adaptive_avg_pool2d(x, k)                                # (B, C, k, k)
    y = layer_norm_ckk(y, params['ln0_w'], params['ln0_b'])
    y = depthwise_conv_same_tiny(y, params['conv0_w'][:, 0])     # conv0 (groups=C)
    y = layer_norm_ckk(y, params['ln1_w'], params['ln1_b'])
    y = jax.nn.relu(y)                                           # dynamic filters

    # --- hot path: per-(b, c) depthwise conv of the ORIGINAL input with its
    #     dynamically generated filter (== F.conv2d(..., groups=B*C)) ---
    return dyn_depthwise_conv_same(x, y)                         # (B, C, H, W)


def _reference_dyn_dw_conv(x, w):
    # Pure-JAX reference of the hot conv, for correctness asserts.
    B, C, H, W = x.shape
    k = w.shape[-1]
    p = k // 2
    xp = jnp.pad(x, ((0, 0), (0, 0), (p, p), (p, p)))
    out = jnp.zeros_like(x)
    for i in range(k):
        for j in range(k):
            out = out + xp[:, :, i:i + H, j:j + W] * w[:, :, i:i + 1, j:j + 1]
    return out


if __name__ == "__main__":
    B, C, H, W, K = 2, 4, 16, 16, 3       # in_channels == out_channels == 4
    key = jax.random.PRNGKey(0)
    kx, kp, kf = jax.random.split(key, 3)
    x = jax.random.normal(kx, (B, C, H, W), jnp.float32)
    params = init_params(kp, C, C, K)

    # 1) Pallas depthwise kernel vs pure-JAX reference (f32 I/O).
    filt = jax.random.normal(kf, (B, C, K, K), jnp.float32)
    got = jax.block_until_ready(dyn_depthwise_conv_same(x, filt))
    want = _reference_dyn_dw_conv(x, filt)
    assert bool(jnp.allclose(got, want, atol=1e-3, rtol=1e-3)), "pallas conv mismatch (f32)"

    # 2) bf16 I/O path (f32 accumulation) -- the halved-HBM path used when the
    #    surrounding model already carries bf16 activations.
    x_bf, filt_bf = x.astype(jnp.bfloat16), filt.astype(jnp.bfloat16)
    got_bf = jax.block_until_ready(dyn_depthwise_conv_same(x_bf, filt_bf))
    want_bf = _reference_dyn_dw_conv(x_bf.astype(jnp.float32),
                                     filt_bf.astype(jnp.float32))
    assert got_bf.dtype == jnp.bfloat16
    assert bool(jnp.allclose(got_bf.astype(jnp.float32), want_bf,
                             atol=1e-2, rtol=5e-2)), "pallas conv mismatch (bf16)"

    # 3) Full SelfDWConv2d forward.
    fwd = jax.jit(functools.partial(self_dw_conv2d, kernel_size=K))
    out = jax.block_until_ready(fwd(params, x))
    assert out.shape == (B, C, H, W), out.shape
    assert bool(jnp.isfinite(out).all())
    print("KERNEL_OK")
</pallas_src>

<mosaic_0001>
module attributes {stable_mosaic.version = 11 : i64} {
  func.func @_dw_conv_flat_kernel(%arg0: i32, %arg1: memref<8x256xf32, #tpu.memory_space<vmem>>, %arg2: memref<8x9xf32, #tpu.memory_space<vmem>>, %arg3: memref<9x256xf32, #tpu.memory_space<vmem>>, %arg4: memref<8x256xf32, #tpu.memory_space<vmem>>) attributes {dimension_semantics = [#tpu.dimension_semantics<parallel>], iteration_bounds = array<i64: 1>, scalar_prefetch = 0 : i64, scratch_operands = 0 : i64, tpu.core_type = #tpu.core_type<tc>, window_params = [{transform_indices = @transform_0, window_bounds = array<i64: 8, 256>}, {transform_indices = @transform_1, window_bounds = array<i64: 8, 9>}, {pipeline_mode = #tpu.pipeline_mode<synchronous>, transform_indices = @transform_2, window_bounds = array<i64: 9, 256>}, {transform_indices = @transform_3, window_bounds = array<i64: 8, 256>}]} {
    %c0 = arith.constant 0 : index
    %c0_0 = arith.constant 0 : index
    %0 = vector.load %arg3[%c0, %c0_0] : memref<9x256xf32, #tpu.memory_space<vmem>>, vector<1x256xf32>
    %c1 = arith.constant 1 : index
    %c0_1 = arith.constant 0 : index
    %1 = vector.load %arg3[%c1, %c0_1] : memref<9x256xf32, #tpu.memory_space<vmem>>, vector<1x256xf32>
    %c2 = arith.constant 2 : index
    %c0_2 = arith.constant 0 : index
    %2 = vector.load %arg3[%c2, %c0_2] : memref<9x256xf32, #tpu.memory_space<vmem>>, vector<1x256xf32>
    %c3 = arith.constant 3 : index
    %c0_3 = arith.constant 0 : index
    %3 = vector.load %arg3[%c3, %c0_3] : memref<9x256xf32, #tpu.memory_space<vmem>>, vector<1x256xf32>
    %c5 = arith.constant 5 : index
    %c0_4 = arith.constant 0 : index
    %4 = vector.load %arg3[%c5, %c0_4] : memref<9x256xf32, #tpu.memory_space<vmem>>, vector<1x256xf32>
    %c6 = arith.constant 6 : index
    %c0_5 = arith.constant 0 : index
    %5 = vector.load %arg3[%c6, %c0_5] : memref<9x256xf32, #tpu.memory_space<vmem>>, vector<1x256xf32>
    %c7 = arith.constant 7 : index
    %c0_6 = arith.constant 0 : index
    %6 = vector.load %arg3[%c7, %c0_6] : memref<9x256xf32, #tpu.memory_space<vmem>>, vector<1x256xf32>
    %c8 = arith.constant 8 : index
    %c0_7 = arith.constant 0 : index
    %7 = vector.load %arg3[%c8, %c0_7] : memref<9x256xf32, #tpu.memory_space<vmem>>, vector<1x256xf32>
    %c0_i32 = arith.constant 0 : i32
    %c8_i32 = arith.constant 8 : i32
    %8 = arith.muli %c0_i32, %c8_i32 : i32
    %9 = tpu.assume_multiple %8, 8 : i32
    %10 = arith.index_cast %9 : i32 to index
    %c0_8 = arith.constant 0 : index
    %11 = vector.load %arg1[%10, %c0_8] : memref<8x256xf32, #tpu.memory_space<vmem>>, vector<8x256xf32>
    %12 = arith.index_cast %9 : i32 to index
    %c0_9 = arith.constant 0 : index
    %13 = vector.load %arg2[%12, %c0_9] : memref<8x9xf32, #tpu.memory_space<vmem>>, vector<8x9xf32>
    %14 = vector.extract_strided_slice %13 {offsets = [0, 4], sizes = [8, 1], strides = [1, 1]} : vector<8x9xf32> to vector<8x1xf32>
    %15 = vector.broadcast %14 : vector<8x1xf32> to vector<8x256xf32>
    %16 = arith.mulf %11, %15 : vector<8x256xf32>
    %c17_i32 = arith.constant 17 : i32
    %17 = tpu.dynamic_rotate %11 by %c17_i32 dim 1 : vector<8x256xf32>, i32 -> vector<8x256xf32>
    %18 = vector.broadcast %0 : vector<1x256xf32> to vector<8x256xf32>
    %19 = arith.mulf %17, %18 : vector<8x256xf32>
    %20 = vector.extract_strided_slice %13 {offsets = [0, 0], sizes = [8, 1], strides = [1, 1]} : vector<8x9xf32> to vector<8x1xf32>
    %21 = vector.broadcast %20 : vector<8x1xf32> to vector<8x256xf32>
    %22 = arith.mulf %19, %21 : vector<8x256xf32>
    %23 = arith.addf %16, %22 : vector<8x256xf32>
    %c16_i32 = arith.constant 16 : i32
    %24 = tpu.dynamic_rotate %11 by %c16_i32 dim 1 : vector<8x256xf32>, i32 -> vector<8x256xf32>
    %25 = vector.broadcast %1 : vector<1x256xf32> to vector<8x256xf32>
    %26 = arith.mulf %24, %25 : vector<8x256xf32>
    %27 = vector.extract_strided_slice %13 {offsets = [0, 1], sizes = [8, 1], strides = [1, 1]} : vector<8x9xf32> to vector<8x1xf32>
    %28 = vector.broadcast %27 : vector<8x1xf32> to vector<8x256xf32>
    %29 = arith.mulf %26, %28 : vector<8x256xf32>
    %30 = arith.addf %23, %29 : vector<8x256xf32>
    %c15_i32 = arith.constant 15 : i32
    %31 = tpu.dynamic_rotate %11 by %c15_i32 dim 1 : vector<8x256xf32>, i32 -> vector<8x256xf32>
    %32 = vector.broadcast %2 : vector<1x256xf32> to vector<8x256xf32>
    %33 = arith.mulf %31, %32 : vector<8x256xf32>
    %34 = vector.extract_strided_slice %13 {offsets = [0, 2], sizes = [8, 1], strides = [1, 1]} : vector<8x9xf32> to vector<8x1xf32>
    %35 = vector.broadcast %34 : vector<8x1xf32> to vector<8x256xf32>
    %36 = arith.mulf %33, %35 : vector<8x256xf32>
    %37 = arith.addf %30, %36 : vector<8x256xf32>
    %c1_i32 = arith.constant 1 : i32
    %38 = tpu.dynamic_rotate %11 by %c1_i32 dim 1 : vector<8x256xf32>, i32 -> vector<8x256xf32>
    %39 = vector.broadcast %3 : vector<1x256xf32> to vector<8x256xf32>
    %40 = arith.mulf %38, %39 : vector<8x256xf32>
    %41 = vector.extract_strided_slice %13 {offsets = [0, 3], sizes = [8, 1], strides = [1, 1]} : vector<8x9xf32> to vector<8x1xf32>
    %42 = vector.broadcast %41 : vector<8x1xf32> to vector<8x256xf32>
    %43 = arith.mulf %40, %42 : vector<8x256xf32>
    %44 = arith.addf %37, %43 : vector<8x256xf32>
    %c255_i32 = arith.constant 255 : i32
    %45 = tpu.dynamic_rotate %11 by %c255_i32 dim 1 : vector<8x256xf32>, i32 -> vector<8x256xf32>
    %46 = vector.broadcast %4 : vector<1x256xf32> to vector<8x256xf32>
    %47 = arith.mulf %45, %46 : vector<8x256xf32>
    %48 = vector.extract_strided_slice %13 {offsets = [0, 5], sizes = [8, 1], strides = [1, 1]} : vector<8x9xf32> to vector<8x1xf32>
    %49 = vector.broadcast %48 : vector<8x1xf32> to vector<8x256xf32>
    %50 = arith.mulf %47, %49 : vector<8x256xf32>
    %51 = arith.addf %44, %50 : vector<8x256xf32>
    %c241_i32 = arith.constant 241 : i32
    %52 = tpu.dynamic_rotate %11 by %c241_i32 dim 1 : vector<8x256xf32>, i32 -> vector<8x256xf32>
    %53 = vector.broadcast %5 : vector<1x256xf32> to vector<8x256xf32>
    %54 = arith.mulf %52, %53 : vector<8x256xf32>
    %55 = vector.extract_strided_slice %13 {offsets = [0, 6], sizes = [8, 1], strides = [1, 1]} : vector<8x9xf32> to vector<8x1xf32>
    %56 = vector.broadcast %55 : vector<8x1xf32> to vector<8x256xf32>
    %57 = arith.mulf %54, %56 : vector<8x256xf32>
    %58 = arith.addf %51, %57 : vector<8x256xf32>
    %c240_i32 = arith.constant 240 : i32
    %59 = tpu.dynamic_rotate %11 by %c240_i32 dim 1 : vector<8x256xf32>, i32 -> vector<8x256xf32>
    %60 = vector.broadcast %6 : vector<1x256xf32> to vector<8x256xf32>
    %61 = arith.mulf %59, %60 : vector<8x256xf32>
    %62 = vector.extract_strided_slice %13 {offsets = [0, 7], sizes = [8, 1], strides = [1, 1]} : vector<8x9xf32> to vector<8x1xf32>
    %63 = vector.broadcast %62 : vector<8x1xf32> to vector<8x256xf32>
    %64 = arith.mulf %61, %63 : vector<8x256xf32>
    %65 = arith.addf %58, %64 : vector<8x256xf32>
    %c239_i32 = arith.constant 239 : i32
    %66 = tpu.dynamic_rotate %11 by %c239_i32 dim 1 : vector<8x256xf32>, i32 -> vector<8x256xf32>
    %67 = vector.broadcast %7 : vector<1x256xf32> to vector<8x256xf32>
    %68 = arith.mulf %66, %67 : vector<8x256xf32>
    %69 = vector.extract_strided_slice %13 {offsets = [0, 8], sizes = [8, 1], strides = [1, 1]} : vector<8x9xf32> to vector<8x1xf32>
    %70 = vector.broadcast %69 : vector<8x1xf32> to vector<8x256xf32>
    %71 = arith.mulf %68, %70 : vector<8x256xf32>
    %72 = arith.addf %65, %71 : vector<8x256xf32>
    %73 = arith.index_cast %9 : i32 to index
    %c0_10 = arith.constant 0 : index
    %74 = vector.load %arg4[%73, %c0_10] : memref<8x256xf32, #tpu.memory_space<vmem>>, vector<8x256xf32>
    tpu.vector_store %arg4[%73, %c0_10], %72 {strides = array<i32>} : memref<8x256xf32, #tpu.memory_space<vmem>>, vector<8x256xf32>,
    %c1_i32_11 = arith.constant 1 : i32
    return
  }
  func.func @transform_0(%arg0: i32) -> (i32, i32) {
    %c0_i32 = arith.constant 0 : i32
    %c0_i32_0 = arith.constant 0 : i32
    return %arg0, %c0_i32 : i32, i32
  }
  func.func @transform_1(%arg0: i32) -> (i32, i32) {
    %c0_i32 = arith.constant 0 : i32
    %c0_i32_0 = arith.constant 0 : i32
    return %arg0, %c0_i32 : i32, i32
  }
  func.func @transform_2(%arg0: i32) -> (i32, i32) {
    %c0_i32 = arith.constant 0 : i32
    %c0_i32_0 = arith.constant 0 : i32
    %c0_i32_1 = arith.constant 0 : i32
    return %c0_i32, %c0_i32_0 : i32, i32
  }
  func.func @transform_3(%arg0: i32) -> (i32, i32) {
    %c0_i32 = arith.constant 0 : i32
    %c0_i32_0 = arith.constant 0 : i32
    return %arg0, %c0_i32 : i32, i32
  }
}

</mosaic_0001>

<bundles_post_ra>
// kernel: tpu_custom_call.1
= control target key start
LH: loop header
LB: loop body
LE: loop exit
PB: predicated region body
PF: predicated region fallthrough
CT: control target
= control target key end

     0   :  { %8 = vsyncpa [#allocation3], 0  ;;  %s534_s0 = inlined_call_operand.hbm [shape: f32[8,256], index: 0, kind: input, shape index: {}]   ;;  %s535_s1 = inlined_call_operand.hbm [shape: f32[8,9], index: 1, kind: input, shape index: {}]   ;;  %s536_s2 = inlined_call_operand.hbm [shape: f32[9,256], index: 2, kind: input, shape index: {}]   ;;  %s537_s3 = inlined_call_operand.hbm [shape: f32[8,256], index: 3, kind: output, shape index: {}]  }
   0x1   :  { %9 = vsyncpa [#allocation6], 0  ;;  %s27_s14 = sshll.u32 %s535_s1, 4  ;;  %s28_s14 = int_to_ptr.hbm [resolvable:$true] %s27_s14 }
   0x2   :  { %10 = vsyncpa [#allocation4], 0  ;;  %s420_s15 = smov [#allocation5]   ;;  %s16_s19 = sshll.u32 %s534_s0, 4  ;;  %s17_s19 = int_to_ptr.hbm [resolvable:$true] %s16_s19 }
   0x3   :  { %s29_s16 = sshll.u32 %s420_s15, 4  ;;  %s421_s20 = smov [#allocation2]   ;;  %s30_s16 = int_to_ptr.vmem [resolvable:$true] %s29_s16 }
   0x4   :  { %32 = dma.hbm_to_vmem [thread:$0]  %s28_s14, 128, %s30_s16, [#allocation6]  }
   0x5   :  { %s18_s21 = sshll.u32 %s421_s20, 4  ;;  %s37_s24 = sshll.u32 %s536_s2, 4  ;;  %s19_s21 = int_to_ptr.vmem [resolvable:$true] %s18_s21  ;;  %s38_s24 = int_to_ptr.hbm [resolvable:$true] %s37_s24 }
   0x6   :  { %21 = dma.hbm_to_vmem [thread:$0]  %s17_s19, 256, %s19_s21, [#allocation3]  }
   0x7   :  { %s422_s1 = smov [#allocation7]   ;;  %s423_s26 = smov 256  }
   0x8   :  { %s39_s25 = sshll.u32 %s422_s1, 4  ;;  %s424_s27 = smov 16   ;;  %s40_s25 = int_to_ptr.vmem [resolvable:$true] %s39_s25 }
   0x9   :  { %45 = dma.hbm_to_vmem [thread:$0]  %s38_s24, 512, %s40_s25, [#allocation6], %s423_s26, %s423_s26, %s424_s27  }
   0xa   :  { %414 = dma.done.wait [#allocation3], 256  }
   0xb   :  { %415 = vsyncadd [#allocation3], 4294967040 }
   0xc   :  { %416 = dma.done.wait [#allocation6], 640  }
   0xd   :  { %417 = vsyncadd [#allocation6], 4294966656  ;;  %v425_v0 = vmov 4   ;;  %v426_v1 = vmov 0   ;;  %v78_v2 = vld [vmem:[#allocation5] sm:$0xff]  ;;  %v471_v3 = vld [vmem:[#allocation2 + $0x8] sm:$0xff]  ;;  %v90_v26 = vlaneseq }
   0xe   :  { %308 = vset.pattern.permute.xlu0 %v425_v0  ;;  %309 = vset.pattern.permute.xlu1 %v426_v1  ;;  %s427_s0 = smov 17   ;;  %v474_v4 = vld [vmem:[#allocation2] sm:$0xff]  ;;  %v428_v5 = vmov 1   ;;  %s429_s2 = smov 15   ;;  %v430_v6 = vmov 2   ;;  %v432_v7 = vmov 5  }
   0xf   :  { %81 = vperm.xlu0 %308, %v78_v2   ;;  %88 = vrot.lane.b32.xlu1 %v471_v3, %s427_s0  ;;  %s431_s28 = smov 1   ;;  %v433_v8 = vmov 3   ;;  %s434_s29 = smov 127   ;;  %v435_v9 = vmov 8   ;;  %v437_v10 = vmov 6   ;;  %v440_v11 = vmov 7  }
  0x10   :  { %110 = vrot.lane.b32.xlu2 %v474_v4, %s424_s27  ;;  %s436_s30 = smov 113   ;;  %s438_s4 = smov 111   ;;  %v495_v28 = vand.u32 127, %v90_v26  ;;  %v58_v29 = vld [vmem:[#allocation7] ss:$8 sm:$0x3] }
  0x11   :  { %316 = vset.pattern.permute.xlu2 %v435_v9  ;;  %s439_s5 = smov 112   ;;  %v60_v30 = vld [vmem:[#allocation7 + $0x1] ss:$8 sm:$0x3]  ;;  %v96_v33 = vperm.slane %v58_v29, 0  ;;  %v97_v34 = vperm.slane %v58_v29, 1 }
  0x12   :  { %vm92_vm0 = vcmp.lt.s32.totalorder %v495_v28, 17  ;;  %vm114_vm1 = vcmp.lt.s32.totalorder %v495_v28, 16  ;;  %v118_v37 = vperm.slane %v60_v30, 0  ;;  %v119_v38 = vperm.slane %v60_v30, 1  ;;  %s441_s6 = smov [#allocation8]   ;;  %s275_s10 = sshll.u32 %s537_s3, 4  ;;  %s276_s10 = int_to_ptr.hbm [resolvable:$true] %s275_s10 }
  0x13   :  { %v62_v39 = vld [vmem:[#allocation7 + $0x2] ss:$8 sm:$0x3]  ;;  %vm136_vm2 = vcmp.lt.s32.totalorder %v495_v28, 15  ;;  %vm158_vm3 = vcmp.lt.s32.totalorder %v495_v28, 1  ;;  %vm180_vm4 = vcmp.lt.s32.totalorder %v495_v28, 127 }
  0x14   :  { %v140_v45 = vperm.slane %v62_v39, 0  ;;  %v141_v46 = vperm.slane %v62_v39, 1  ;;  %v64_v49 = vld [vmem:[#allocation7 + $0x3] ss:$8 sm:$0x3]  ;;  %vm202_vm5 = vcmp.lt.s32.totalorder %v495_v28, 113 }
  0x15   :  { %v66_v50 = vld [vmem:[#allocation7 + $0x5] ss:$8 sm:$0x3]  ;;  %v162_v58 = vperm.slane %v64_v49, 0  ;;  %v163_v59 = vperm.slane %v64_v49, 1  ;;  %vm224_vm6 = vcmp.lt.s32.totalorder %v495_v28, 112 }
  0x16   :  { %v184_v60 = vperm.slane %v66_v50, 0  ;;  %v185_v61 = vperm.slane %v66_v50, 1  ;;  %v72_v29 = vld [vmem:[#allocation7 + $0x10] ss:$8 sm:$0x3]  ;;  %vm246_vm7 = vcmp.lt.s32.totalorder %v495_v28, 111 }
  0x17   :  { %103 = vperm.xlu1 %309, %v78_v2   ;;  %86 = vrot.lane.b32.xlu0 %v474_v4, %s427_s0  ;;  %v251_v39 = vperm.slane %v72_v29, 1  ;;  %s273_s7 = sshll.u32 %s441_s6, 4  ;;  %s274_s7 = int_to_ptr.vmem [resolvable:$true] %s273_s7 }
  0x18   :  { %310 = vset.pattern.permute.xlu0 %v428_v5  ;;  %112 = vrot.lane.b32.xlu2 %v471_v3, %s424_s27 }
  0x1f   :  { %132 = vrot.lane.b32.xlu1 %v474_v4, %s429_s2  ;;  %125 = vperm.xlu0 %310, %v78_v2  }
  0x20   :  { %311 = vset.pattern.permute.xlu1 %v430_v6  ;;  %134 = vrot.lane.b32.xlu2 %v471_v3, %s429_s2 }
  0x27   :  { %147 = vperm.xlu1 %311, %v78_v2   ;;  %156 = vrot.lane.b32.xlu0 %v471_v3, %s431_s28 }
  0x28   :  { %313 = vset.pattern.permute.xlu0 %v432_v7  ;;  %154 = vrot.lane.b32.xlu2 %v474_v4, %s431_s28  ;;  %v68_v7 = vld [vmem:[#allocation7 + $0x6] ss:$8 sm:$0x3] }
  0x2f   :  { %312 = vset.pattern.permute.xlu1 %v433_v8  ;;  %178 = vrot.lane.b32.xlu0 %v471_v3, %s434_s29 }
  0x30   :  { %169 = vperm.xlu1 %312, %v78_v2   ;;  %176 = vrot.lane.b32.xlu2 %v474_v4, %s434_s29 }
  0x37   :  { %191 = vperm.xlu0 %313, %v78_v2  }
  0x38   :  { %198 = vrot.lane.b32.xlu1 %v474_v4, %s436_s30  ;;  %200 = vrot.lane.b32.xlu2 %v471_v3, %s436_s30 }
  0x39   :  { %314 = vset.pattern.permute.xlu1 %v437_v10 }
  0x3f   :  { %244 = vrot.lane.b32.xlu0 %v471_v3, %s438_s4 }
  0x40   :  { %220 = vrot.lane.b32.xlu1 %v474_v4, %s439_s5  ;;  %222 = vrot.lane.b32.xlu2 %v471_v3, %s439_s5 }
  0x41   :  { %317 = vset.pattern.permute.xlu0 %v435_v9 }
  0x48   :  { %213 = vperm.xlu1 %314, %v78_v2   ;;  %242 = vrot.lane.b32.xlu2 %v474_v4, %s438_s4 }
  0x50   :  { %315 = vset.pattern.permute.xlu1 %v440_v11  ;;  %257 = vperm.xlu2 %316, %v78_v2  }
  0x51   :  { %235 = vperm.xlu1 %315, %v78_v2  }
  0x6a   :  { %v111_v12 = vpop.permute.xlu2 %110 }
  0x72   :  { %v113_v13 = vpop.permute.xlu2 %112 }
  0x73   :  { %v115_v40 = vsel %vm114_vm1, %v111_v12, %v113_v13  ;;  %v116_v41 = vsel %vm114_vm1, %v113_v13, %v111_v12 }
  0x74   :  { %v122_v47 = vmul.f32 %v118_v37, %v116_v41  ;;  %v123_v48 = vmul.f32 %v119_v38, %v115_v40  ;;  %v250_v38 = vperm.slane %v72_v29, 0 }
  0x7a   :  { %v135_v16 = vpop.permute.xlu2 %134 }
  0x81   :  { %v89_v14 = vpop.permute.xlu1 %88  ;;  %v82_v15 = vpop.permute.xlu0 %81 }
  0x82   :  { %v155_v20 = vpop.permute.xlu2 %154  ;;  %v84_v51 = vmul.f32 %v82_v15, %v474_v4  ;;  %v85_v52 = vmul.f32 %v82_v15, %v471_v3 }
  0x89   :  { %v104_v17 = vpop.permute.xlu1 %103  ;;  %v87_v18 = vpop.permute.xlu0 %86 }
  0x8a   :  { %v177_v23 = vpop.permute.xlu2 %176  ;;  %v93_v35 = vsel %vm92_vm0, %v87_v18, %v89_v14  ;;  %v94_v36 = vsel %vm92_vm0, %v89_v14, %v87_v18  ;;  %v70_v14 = vld [vmem:[#allocation7 + $0x7] ss:$8 sm:$0x3]  ;;  %v207_v18 = vperm.slane %v68_v7, 1 }
  0x8b   :  { %v100_v42 = vmul.f32 %v96_v33, %v94_v36  ;;  %v101_v43 = vmul.f32 %v97_v34, %v93_v35  ;;  %v229_v35 = vperm.slane %v70_v14, 1 }
  0x8d   :  { %v106_v54 = vmul.f32 %v104_v17, %v100_v42  ;;  %v107_v55 = vmul.f32 %v104_v17, %v101_v43  ;;  %v206_v17 = vperm.slane %v68_v7, 0 }
  0x8f   :  { %v108_v8 = vadd.f32 %v106_v54, %v84_v51  ;;  %v109_v9 = vadd.f32 %v107_v55, %v85_v52 }
  0x91   :  { %v133_v19 = vpop.permute.xlu1 %132  ;;  %v126_v21 = vpop.permute.xlu0 %125 }
  0x92   :  { %v493_v27 = vpop.permute.xlu2 %200  ;;  %v137_v56 = vsel %vm136_vm2, %v133_v19, %v135_v16  ;;  %v138_v57 = vsel %vm136_vm2, %v135_v16, %v133_v19  ;;  %v128_v63 = vmul.f32 %v126_v21, %v122_v47  ;;  %v129_v0 = vmul.f32 %v126_v21, %v123_v48 }
  0x93   :  { %v144_v4 = vmul.f32 %v140_v45, %v138_v57  ;;  %v145_v3 = vmul.f32 %v141_v46, %v137_v56 }
  0x94   :  { %v131_v21 = vadd.f32 %v129_v0, %v109_v9 }
  0x99   :  { %v148_v22 = vpop.permute.xlu1 %147  ;;  %v157_v24 = vpop.permute.xlu0 %156 }
  0x9a   :  { %v501_v44 = vpop.permute.xlu2 %222  ;;  %v159_v1 = vsel %vm158_vm3, %v155_v20, %v157_v24  ;;  %v160_v2 = vsel %vm158_vm3, %v157_v24, %v155_v20  ;;  %v150_v10 = vmul.f32 %v148_v22, %v144_v4  ;;  %v151_v11 = vmul.f32 %v148_v22, %v145_v3 }
  0x9b   :  { %v166_v12 = vmul.f32 %v162_v58, %v160_v2  ;;  %v167_v13 = vmul.f32 %v163_v59, %v159_v1  ;;  %v130_v20 = vadd.f32 %v128_v63, %v108_v8 }
  0x9c   :  { %v153_v34 = vadd.f32 %v151_v11, %v131_v21 }
  0x9d   :  { %v152_v33 = vadd.f32 %v150_v10, %v130_v20 }
  0xa1   :  { %v179_v31 = vpop.permute.xlu0 %178 }
  0xa2   :  { %v491_v25 = vpop.permute.xlu1 %169  ;;  %v181_v5 = vsel %vm180_vm4, %v177_v23, %v179_v31  ;;  %v182_v6 = vsel %vm180_vm4, %v179_v31, %v177_v23  ;;  %v243_v19 = vpop.permute.xlu2 %242  ;;  %v228_v31 = vperm.slane %v70_v14, 0 }
  0xa3   :  { %v188_v15 = vmul.f32 %v184_v60, %v181_v5  ;;  %v189_v16 = vmul.f32 %v185_v61, %v182_v6  ;;  %v172_v24 = vmul.f32 %v491_v25, %v166_v12  ;;  %v173_v23 = vmul.f32 %v491_v25, %v167_v13 }
  0xa5   :  { %v174_v40 = vadd.f32 %v172_v24, %v152_v33  ;;  %v175_v41 = vadd.f32 %v173_v23, %v153_v34 }
  0xa9   :  { %v192_v62 = vpop.permute.xlu0 %191 }
  0xaa   :  { %v498_v32 = vpop.permute.xlu1 %198  ;;  %v194_v36 = vmul.f32 %v192_v62, %v188_v15  ;;  %v195_v37 = vmul.f32 %v192_v62, %v189_v16  ;;  %v258_v56 = vpop.permute.xlu2 %257 }
  0xab   :  { %v203_v22 = vsel %vm202_vm5, %v498_v32, %v493_v27  ;;  %v204_v30 = vsel %vm202_vm5, %v493_v27, %v498_v32 }
  0xac   :  { %v210_v42 = vmul.f32 %v206_v17, %v203_v22  ;;  %v211_v43 = vmul.f32 %v207_v18, %v204_v30  ;;  %v196_v49 = vadd.f32 %v194_v36, %v174_v40  ;;  %v197_v50 = vadd.f32 %v195_v37, %v175_v41 }
  0xb1   :  { %v245_v25 = vpop.permute.xlu0 %244 }
  0xb2   :  { %v221_v53 = vpop.permute.xlu1 %220  ;;  %v247_v45 = vsel %vm246_vm7, %v243_v19, %v245_v25  ;;  %v248_v46 = vsel %vm246_vm7, %v245_v25, %v243_v19 }
  0xb3   :  { %v225_v27 = vsel %vm224_vm6, %v221_v53, %v501_v44  ;;  %v226_v32 = vsel %vm224_vm6, %v501_v44, %v221_v53  ;;  %v254_v51 = vmul.f32 %v250_v38, %v247_v45  ;;  %v255_v52 = vmul.f32 %v251_v39, %v248_v46 }
  0xb4   :  { %v232_v54 = vmul.f32 %v228_v31, %v225_v27  ;;  %v233_v55 = vmul.f32 %v229_v35, %v226_v32 }
  0xb5   :  { %v260_v62 = vmul.f32 %v258_v56, %v254_v51  ;;  %v261_v63 = vmul.f32 %v258_v56, %v255_v52 }
  0xba   :  { %v214_v26 = vpop.permute.xlu1 %213 }
  0xbb   :  { %v216_v47 = vmul.f32 %v214_v26, %v210_v42  ;;  %v217_v48 = vmul.f32 %v214_v26, %v211_v43 }
  0xbd   :  { %v218_v58 = vadd.f32 %v216_v47, %v196_v49  ;;  %v219_v59 = vadd.f32 %v217_v48, %v197_v50 }
  0xc3   :  { %v236_v57 = vpop.permute.xlu1 %235 }
  0xc4   :  { %v238_v60 = vmul.f32 %v236_v57, %v232_v54  ;;  %v239_v61 = vmul.f32 %v236_v57, %v233_v55 }
  0xc6   :  { %v240_v28 = vadd.f32 %v238_v60, %v218_v58  ;;  %v241_v44 = vadd.f32 %v239_v61, %v219_v59 }
  0xc8   :  { %v262_v53 = vadd.f32 %v260_v62, %v240_v28  ;;  %v263_v0 = vadd.f32 %v261_v63, %v241_v44 }
  0xca   :  { %266 = vst [vmem:[#allocation8] sm:$0xff] %v262_v53 }
  0xcb   :  { %267 = vst [vmem:[#allocation8 + $0x8] sm:$0xff] %v263_v0 }
  0xcc   :  { %278 = dma.vmem_to_hbm [thread:$0]  %s274_s7, 256, %s276_s10, [#allocation4]  }
  0xcd   :  { %418 = dma.done.wait [#allocation4], 256  }
  0xce   :  { %419 = vsyncadd [#allocation4], 4294967040 }
  0xcf   :  { %283 = vsyncpa [#allocation3], 1 }
  0xd0   :  { %284 = vsyncpa [#allocation6], 1 }
  0xd1   :  { %285 = vsyncpa [#allocation4], 1 }

</bundles_post_ra>
